<compile_context>
chip_gen: v7x
topology: tpu7x:2x2x1
jax: 0.10.0
libtpu: 0.0.40
codegen_flags: <defaults>
</compile_context>

<pallas_src>
import functools

import jax
import jax.numpy as jnp
from jax import lax
from jax.experimental import pallas as pl
from jax.experimental.pallas import tpu as pltpu


# ----------------------------------------------------------------------------
# Fused kernel: one grid step = one batch element, channels on sublanes,
# flattened H*W on lanes.
# ----------------------------------------------------------------------------
def _fused_block_kernel(x_ref, w1_ref, w2_ref, s1_ref, b1_ref, s2_ref, b2_ref,
                        m_ref, o_ref, *, H, W):
    HW = H * W

    x = x_ref[...].astype(jnp.float32)               # (Cin, HW)

    # Boundary masks (1, HW): realize the conv's zero padding.
    row_top = m_ref[0:1, :]      # 0.0 where h == 0      (ky = 0 slab)
    row_bot = m_ref[1:2, :]      # 0.0 where h == H - 1  (ky = 2 slab)
    col_lft = m_ref[2:3, :]      # 0.0 where w == 0      (kx = 0 group)
    col_rgt = m_ref[3:4, :]      # 0.0 where w == W - 1  (kx = 2 group)

    def conv3x3(inp, w_ref):
        # inp: (Cin, HW) f32;  w_ref[kx]: (Cout, 3*Cin), K ordered ky-major.
        # Vertical (ky) shifts: rotate the flat image by +/-W lanes and zero
        # the wrapped rows with the row masks.
        up = pltpu.roll(inp, shift=W, axis=1) * row_top        # value of row h-1
        down = pltpu.roll(inp, shift=HW - W, axis=1) * row_bot  # value of row h+1
        cat = jnp.concatenate([up, inp, down], axis=0)          # (3*Cin, HW)
        # One GEMM per kx group; accumulation stays in registers (f32).
        d0 = jnp.dot(w_ref[0], cat, preferred_element_type=jnp.float32)
        d1 = jnp.dot(w_ref[1], cat, preferred_element_type=jnp.float32)
        d2 = jnp.dot(w_ref[2], cat, preferred_element_type=jnp.float32)
        # Horizontal (kx) shifts applied to the small per-group results; the
        # wrapped columns are exactly the padding columns -> zeroed by masks.
        left = pltpu.roll(d0, shift=1, axis=1) * col_lft        # uses col w-1
        right = pltpu.roll(d2, shift=HW - 1, axis=1) * col_rgt  # uses col w+1
        return left + d1 + right                                # (Cout, HW) f32

    # conv1 -> bn1 -> relu1   (whole-image vectorized epilogue)
    a1 = jnp.maximum(conv3x3(x, w1_ref) * s1_ref[...] + b1_ref[...], 0.0)

    # conv2 -> bn2 -> +residual -> relu2 ; single dense lane-aligned store.
    y = jnp.maximum(conv3x3(a1, w2_ref) * s2_ref[...] + b2_ref[...] + x, 0.0)
    o_ref[...] = y.astype(o_ref.dtype)


# ----------------------------------------------------------------------------
# Wrapper: consumes NCHW flattened to (N, C, H*W); one grid step per image.
# ----------------------------------------------------------------------------
def block_apply(x_flat, params, *, H, W):
    N, C, HW = x_flat.shape
    assert HW == H * W
    Cout = params["w1"].shape[0]
    assert params["w1"].shape == (Cout, C, 3, 3)
    assert params["w2"].shape == (Cout, Cout, 3, 3)
    assert C == Cout, "downsample=None requires inplanes == planes"

    def group_kx(w_oihw):
        # (Cout, Cin, ky, kx) -> (kx, Cout, ky*Cin + cin): one GEMM per kx group.
        co, ci, _, _ = w_oihw.shape
        return jnp.transpose(w_oihw, (3, 0, 2, 1)).reshape(3, co, 3 * ci)

    w1g = group_kx(params["w1"]).astype(jnp.float32)
    w2g = group_kx(params["w2"]).astype(jnp.float32)

    s1 = params["scale1"].reshape(Cout, 1).astype(jnp.float32)
    b1 = params["bias1"].reshape(Cout, 1).astype(jnp.float32)
    s2 = params["scale2"].reshape(Cout, 1).astype(jnp.float32)
    b2 = params["bias2"].reshape(Cout, 1).astype(jnp.float32)

    # Boundary masks (constant-folded under jit).
    lidx = jnp.arange(HW, dtype=jnp.int32)
    hh = lidx // W
    ww = lidx % W
    masks = jnp.stack(
        [(hh > 0), (hh < H - 1), (ww > 0), (ww < W - 1)], axis=0
    ).astype(jnp.float32)                                     # (4, HW)

    kernel = functools.partial(_fused_block_kernel, H=H, W=W)

    macs = N * HW * 9 * (C * Cout + Cout * Cout)
    bytes_accessed = 4 * (N * C * HW + N * Cout * HW
                          + 9 * C * Cout + 9 * Cout * Cout + 4 * Cout + 4 * HW)

    return pl.pallas_call(
        kernel,
        out_shape=jax.ShapeDtypeStruct((N, Cout, HW), x_flat.dtype),
        grid_spec=pltpu.PrefetchScalarGridSpec(
            num_scalar_prefetch=0,
            grid=(N,),
            in_specs=[
                pl.BlockSpec((None, C, HW), lambda n: (n, 0, 0)),        # x
                pl.BlockSpec((3, Cout, 3 * C), lambda n: (0, 0, 0)),     # w1 grouped
                pl.BlockSpec((3, Cout, 3 * Cout), lambda n: (0, 0, 0)),  # w2 grouped
                pl.BlockSpec((Cout, 1), lambda n: (0, 0)),               # scale1
                pl.BlockSpec((Cout, 1), lambda n: (0, 0)),               # bias1
                pl.BlockSpec((Cout, 1), lambda n: (0, 0)),               # scale2
                pl.BlockSpec((Cout, 1), lambda n: (0, 0)),               # bias2
                pl.BlockSpec((4, HW), lambda n: (0, 0)),                 # masks
            ],
            out_specs=pl.BlockSpec((None, Cout, HW), lambda n: (n, 0, 0)),
        ),
        compiler_params=pltpu.CompilerParams(
            dimension_semantics=("parallel",),
            vmem_limit_bytes=32 * 1024 * 1024),
        cost_estimate=pl.CostEstimate(flops=2 * macs, transcendentals=0,
                                      bytes_accessed=bytes_accessed),
    )(x_flat, w1g, w2g, s1, b1, s2, b2, masks)


# ----------------------------------------------------------------------------
# Parameter construction (deterministic, synthetic)
# ----------------------------------------------------------------------------
def init_block_params(key, inplanes, planes, eps=1e-5):
    k1, k2, k3, k4, k5, k6 = jax.random.split(key, 6)

    # Conv weights in PyTorch layout (Cout, Cin, 3, 3), no bias.
    w1 = 0.1 * jax.random.normal(k1, (planes, inplanes, 3, 3), jnp.float32)
    w2 = 0.1 * jax.random.normal(k2, (planes, planes, 3, 3), jnp.float32)

    # BN (fresh module, eval semantics): running_mean=0, running_var=1.
    gamma1 = 1.0 + 0.1 * jax.random.normal(k3, (planes,), jnp.float32)
    beta1 = 0.1 * jax.random.normal(k4, (planes,), jnp.float32)
    gamma2 = 1.0 + 0.1 * jax.random.normal(k5, (planes,), jnp.float32)
    beta2 = 0.1 * jax.random.normal(k6, (planes,), jnp.float32)

    running_mean = jnp.zeros((planes,), jnp.float32)
    running_var = jnp.ones((planes,), jnp.float32)

    def fold(gamma, beta):
        scale = gamma * lax.rsqrt(running_var + eps)
        bias = beta - running_mean * scale
        return scale, bias

    scale1, bias1 = fold(gamma1, beta1)
    scale2, bias2 = fold(gamma2, beta2)
    return dict(w1=w1, w2=w2, scale1=scale1, bias1=bias1,
                scale2=scale2, bias2=bias2)


# ----------------------------------------------------------------------------
# Block forward: NCHW in / NCHW out like PyTorch (only cheap trailing-dim
# reshapes in the wrapper; no NHWC transposes).
# ----------------------------------------------------------------------------
@jax.jit
def block_forward(x_nchw, params):
    N, C, H, W = x_nchw.shape
    y = block_apply(x_nchw.reshape(N, C, H * W), params, H=H, W=W)
    return y.reshape(N, C, H, W)


# Pure-JAX reference for verification
def block_forward_ref(x_nchw, params):
    def conv(xx, w):
        return lax.conv_general_dilated(
            xx, w, window_strides=(1, 1), padding="SAME",
            dimension_numbers=("NCHW", "OIHW", "NCHW"))

    s1 = params["scale1"][None, :, None, None]
    b1 = params["bias1"][None, :, None, None]
    s2 = params["scale2"][None, :, None, None]
    b2 = params["bias2"][None, :, None, None]

    y = jnp.maximum(conv(x_nchw, params["w1"]) * s1 + b1, 0.0)
    y = conv(y, params["w2"]) * s2 + b2 + x_nchw
    return jnp.maximum(y, 0.0)


if __name__ == "__main__":
    key = jax.random.PRNGKey(0)
    kx_, kp_ = jax.random.split(key)

    # small shapes consistent with the module; inplanes == planes (downsample=None)
    N, C, Hsp, Wsp = 2, 8, 16, 16
    x = jax.random.normal(kx_, (N, C, Hsp, Wsp), jnp.float32)  # NCHW, like PyTorch

    params = init_block_params(kp_, inplanes=C, planes=C)

    out = jax.block_until_ready(block_forward(x, params))
    ref = block_forward_ref(x, params)

    assert out.shape == (N, C, Hsp, Wsp)
    err = float(jnp.max(jnp.abs(out - ref)))
    assert err < 1e-3, f"max abs err {err}"

    print("KERNEL_OK")
</pallas_src>

<mosaic_0001>
module attributes {stable_mosaic.version = 11 : i64} {
  func.func @_fused_block_kernel(%arg0: i32, %arg1: memref<1x8x256xf32, #tpu.memory_space<vmem>>, %arg2: memref<3x8x24xf32, #tpu.memory_space<vmem>>, %arg3: memref<3x8x24xf32, #tpu.memory_space<vmem>>, %arg4: memref<8x1xf32, #tpu.memory_space<vmem>>, %arg5: memref<8x1xf32, #tpu.memory_space<vmem>>, %arg6: memref<8x1xf32, #tpu.memory_space<vmem>>, %arg7: memref<8x1xf32, #tpu.memory_space<vmem>>, %arg8: memref<4x256xf32, #tpu.memory_space<vmem>>, %arg9: memref<1x8x256xf32, #tpu.memory_space<vmem>>) attributes {dimension_semantics = [#tpu.dimension_semantics<parallel>], iteration_bounds = array<i64: 2>, scalar_prefetch = 0 : i64, scratch_operands = 0 : i64, tpu.core_type = #tpu.core_type<tc>, window_params = [{transform_indices = @transform_0, window_bounds = array<i64: 1, 8, 256>}, {pipeline_mode = #tpu.pipeline_mode<synchronous>, transform_indices = @transform_1, window_bounds = array<i64: 3, 8, 24>}, {pipeline_mode = #tpu.pipeline_mode<synchronous>, transform_indices = @transform_2, window_bounds = array<i64: 3, 8, 24>}, {pipeline_mode = #tpu.pipeline_mode<synchronous>, transform_indices = @transform_3, window_bounds = array<i64: 8, 1>}, {pipeline_mode = #tpu.pipeline_mode<synchronous>, transform_indices = @transform_4, window_bounds = array<i64: 8, 1>}, {pipeline_mode = #tpu.pipeline_mode<synchronous>, transform_indices = @transform_5, window_bounds = array<i64: 8, 1>}, {pipeline_mode = #tpu.pipeline_mode<synchronous>, transform_indices = @transform_6, window_bounds = array<i64: 8, 1>}, {pipeline_mode = #tpu.pipeline_mode<synchronous>, transform_indices = @transform_7, window_bounds = array<i64: 4, 256>}, {transform_indices = @transform_8, window_bounds = array<i64: 1, 8, 256>}]} {
    %c0 = arith.constant 0 : index
    %c0_0 = arith.constant 0 : index
    %c0_1 = arith.constant 0 : index
    %0 = vector.load %arg1[%c0, %c0_0, %c0_1] : memref<1x8x256xf32, #tpu.memory_space<vmem>>, vector<1x8x256xf32>
    %1 = vector.shape_cast %0 : vector<1x8x256xf32> to vector<8x256xf32>
    %c0_2 = arith.constant 0 : index
    %c0_3 = arith.constant 0 : index
    %2 = vector.load %arg8[%c0_2, %c0_3] : memref<4x256xf32, #tpu.memory_space<vmem>>, vector<1x256xf32>
    %c1 = arith.constant 1 : index
    %c0_4 = arith.constant 0 : index
    %3 = vector.load %arg8[%c1, %c0_4] : memref<4x256xf32, #tpu.memory_space<vmem>>, vector<1x256xf32>
    %c2 = arith.constant 2 : index
    %c0_5 = arith.constant 0 : index
    %4 = vector.load %arg8[%c2, %c0_5] : memref<4x256xf32, #tpu.memory_space<vmem>>, vector<1x256xf32>
    %c3 = arith.constant 3 : index
    %c0_6 = arith.constant 0 : index
    %5 = vector.load %arg8[%c3, %c0_6] : memref<4x256xf32, #tpu.memory_space<vmem>>, vector<1x256xf32>
    %c16_i32 = arith.constant 16 : i32
    %6 = tpu.dynamic_rotate %1 by %c16_i32 dim 1 : vector<8x256xf32>, i32 -> vector<8x256xf32>
    %7 = vector.broadcast %2 : vector<1x256xf32> to vector<8x256xf32>
    %8 = arith.mulf %6, %7 : vector<8x256xf32>
    %c240_i32 = arith.constant 240 : i32
    %9 = tpu.dynamic_rotate %1 by %c240_i32 dim 1 : vector<8x256xf32>, i32 -> vector<8x256xf32>
    %10 = vector.broadcast %3 : vector<1x256xf32> to vector<8x256xf32>
    %11 = arith.mulf %9, %10 : vector<8x256xf32>
    %12 = tpu.concatenate %8, %1, %11 in 0 : vector<8x256xf32>, vector<8x256xf32>, vector<8x256xf32> -> vector<24x256xf32>
    %c0_7 = arith.constant 0 : index
    %c0_8 = arith.constant 0 : index
    %c0_9 = arith.constant 0 : index
    %13 = vector.load %arg2[%c0_7, %c0_8, %c0_9] : memref<3x8x24xf32, #tpu.memory_space<vmem>>, vector<1x8x24xf32>
    %14 = vector.shape_cast %13 : vector<1x8x24xf32> to vector<8x24xf32>
    %cst = arith.constant dense<0.000000e+00> : vector<8x256xf32>
    %15 = tpu.matmul %14, %12, %cst {dimension_numbers = #tpu.dot_dimension_numbers<[1], [0], [0], [1], [0, 0, 1, 1], [], []>} : vector<8x24xf32>, vector<24x256xf32>, vector<8x256xf32> -> vector<8x256xf32>
    %c1_10 = arith.constant 1 : index
    %c0_11 = arith.constant 0 : index
    %c0_12 = arith.constant 0 : index
    %16 = vector.load %arg2[%c1_10, %c0_11, %c0_12] : memref<3x8x24xf32, #tpu.memory_space<vmem>>, vector<1x8x24xf32>
    %17 = vector.shape_cast %16 : vector<1x8x24xf32> to vector<8x24xf32>
    %cst_13 = arith.constant dense<0.000000e+00> : vector<8x256xf32>
    %18 = tpu.matmul %17, %12, %cst_13 {dimension_numbers = #tpu.dot_dimension_numbers<[1], [0], [0], [1], [0, 0, 1, 1], [], []>} : vector<8x24xf32>, vector<24x256xf32>, vector<8x256xf32> -> vector<8x256xf32>
    %c2_14 = arith.constant 2 : index
    %c0_15 = arith.constant 0 : index
    %c0_16 = arith.constant 0 : index
    %19 = vector.load %arg2[%c2_14, %c0_15, %c0_16] : memref<3x8x24xf32, #tpu.memory_space<vmem>>, vector<1x8x24xf32>
    %20 = vector.shape_cast %19 : vector<1x8x24xf32> to vector<8x24xf32>
    %cst_17 = arith.constant dense<0.000000e+00> : vector<8x256xf32>
    %21 = tpu.matmul %20, %12, %cst_17 {dimension_numbers = #tpu.dot_dimension_numbers<[1], [0], [0], [1], [0, 0, 1, 1], [], []>} : vector<8x24xf32>, vector<24x256xf32>, vector<8x256xf32> -> vector<8x256xf32>
    %c1_i32 = arith.constant 1 : i32
    %22 = tpu.dynamic_rotate %15 by %c1_i32 dim 1 : vector<8x256xf32>, i32 -> vector<8x256xf32>
    %23 = vector.broadcast %4 : vector<1x256xf32> to vector<8x256xf32>
    %24 = arith.mulf %22, %23 : vector<8x256xf32>
    %c255_i32 = arith.constant 255 : i32
    %25 = tpu.dynamic_rotate %21 by %c255_i32 dim 1 : vector<8x256xf32>, i32 -> vector<8x256xf32>
    %26 = vector.broadcast %5 : vector<1x256xf32> to vector<8x256xf32>
    %27 = arith.mulf %25, %26 : vector<8x256xf32>
    %28 = arith.addf %24, %18 : vector<8x256xf32>
    %29 = arith.addf %28, %27 : vector<8x256xf32>
    %c0_18 = arith.constant 0 : index
    %c0_19 = arith.constant 0 : index
    %30 = vector.load %arg4[%c0_18, %c0_19] : memref<8x1xf32, #tpu.memory_space<vmem>>, vector<8x1xf32>
    %31 = vector.broadcast %30 : vector<8x1xf32> to vector<8x256xf32>
    %32 = arith.mulf %29, %31 : vector<8x256xf32>
    %c0_20 = arith.constant 0 : index
    %c0_21 = arith.constant 0 : index
    %33 = vector.load %arg5[%c0_20, %c0_21] : memref<8x1xf32, #tpu.memory_space<vmem>>, vector<8x1xf32>
    %34 = vector.broadcast %33 : vector<8x1xf32> to vector<8x256xf32>
    %35 = arith.addf %32, %34 : vector<8x256xf32>
    %cst_22 = arith.constant 0.000000e+00 : f32
    %36 = vector.broadcast %cst_22 : f32 to vector<8x256xf32>
    %37 = arith.maximumf %35, %36 : vector<8x256xf32>
    %c16_i32_23 = arith.constant 16 : i32
    %38 = tpu.dynamic_rotate %37 by %c16_i32_23 dim 1 : vector<8x256xf32>, i32 -> vector<8x256xf32>
    %39 = vector.broadcast %2 : vector<1x256xf32> to vector<8x256xf32>
    %40 = arith.mulf %38, %39 : vector<8x256xf32>
    %c240_i32_24 = arith.constant 240 : i32
    %41 = tpu.dynamic_rotate %37 by %c240_i32_24 dim 1 : vector<8x256xf32>, i32 -> vector<8x256xf32>
    %42 = vector.broadcast %3 : vector<1x256xf32> to vector<8x256xf32>
    %43 = arith.mulf %41, %42 : vector<8x256xf32>
    %44 = tpu.concatenate %40, %37, %43 in 0 : vector<8x256xf32>, vector<8x256xf32>, vector<8x256xf32> -> vector<24x256xf32>
    %c0_25 = arith.constant 0 : index
    %c0_26 = arith.constant 0 : index
    %c0_27 = arith.constant 0 : index
    %45 = vector.load %arg3[%c0_25, %c0_26, %c0_27] : memref<3x8x24xf32, #tpu.memory_space<vmem>>, vector<1x8x24xf32>
    %46 = vector.shape_cast %45 : vector<1x8x24xf32> to vector<8x24xf32>
    %cst_28 = arith.constant dense<0.000000e+00> : vector<8x256xf32>
    %47 = tpu.matmul %46, %44, %cst_28 {dimension_numbers = #tpu.dot_dimension_numbers<[1], [0], [0], [1], [0, 0, 1, 1], [], []>} : vector<8x24xf32>, vector<24x256xf32>, vector<8x256xf32> -> vector<8x256xf32>
    %c1_29 = arith.constant 1 : index
    %c0_30 = arith.constant 0 : index
    %c0_31 = arith.constant 0 : index
    %48 = vector.load %arg3[%c1_29, %c0_30, %c0_31] : memref<3x8x24xf32, #tpu.memory_space<vmem>>, vector<1x8x24xf32>
    %49 = vector.shape_cast %48 : vector<1x8x24xf32> to vector<8x24xf32>
    %cst_32 = arith.constant dense<0.000000e+00> : vector<8x256xf32>
    %50 = tpu.matmul %49, %44, %cst_32 {dimension_numbers = #tpu.dot_dimension_numbers<[1], [0], [0], [1], [0, 0, 1, 1], [], []>} : vector<8x24xf32>, vector<24x256xf32>, vector<8x256xf32> -> vector<8x256xf32>
    %c2_33 = arith.constant 2 : index
    %c0_34 = arith.constant 0 : index
    %c0_35 = arith.constant 0 : index
    %51 = vector.load %arg3[%c2_33, %c0_34, %c0_35] : memref<3x8x24xf32, #tpu.memory_space<vmem>>, vector<1x8x24xf32>
    %52 = vector.shape_cast %51 : vector<1x8x24xf32> to vector<8x24xf32>
    %cst_36 = arith.constant dense<0.000000e+00> : vector<8x256xf32>
    %53 = tpu.matmul %52, %44, %cst_36 {dimension_numbers = #tpu.dot_dimension_numbers<[1], [0], [0], [1], [0, 0, 1, 1], [], []>} : vector<8x24xf32>, vector<24x256xf32>, vector<8x256xf32> -> vector<8x256xf32>
    %c1_i32_37 = arith.constant 1 : i32
    %54 = tpu.dynamic_rotate %47 by %c1_i32_37 dim 1 : vector<8x256xf32>, i32 -> vector<8x256xf32>
    %55 = vector.broadcast %4 : vector<1x256xf32> to vector<8x256xf32>
    %56 = arith.mulf %54, %55 : vector<8x256xf32>
    %c255_i32_38 = arith.constant 255 : i32
    %57 = tpu.dynamic_rotate %53 by %c255_i32_38 dim 1 : vector<8x256xf32>, i32 -> vector<8x256xf32>
    %58 = vector.broadcast %5 : vector<1x256xf32> to vector<8x256xf32>
    %59 = arith.mulf %57, %58 : vector<8x256xf32>
    %60 = arith.addf %56, %50 : vector<8x256xf32>
    %61 = arith.addf %60, %59 : vector<8x256xf32>
    %c0_39 = arith.constant 0 : index
    %c0_40 = arith.constant 0 : index
    %62 = vector.load %arg6[%c0_39, %c0_40] : memref<8x1xf32, #tpu.memory_space<vmem>>, vector<8x1xf32>
    %63 = vector.broadcast %62 : vector<8x1xf32> to vector<8x256xf32>
    %64 = arith.mulf %61, %63 : vector<8x256xf32>
    %c0_41 = arith.constant 0 : index
    %c0_42 = arith.constant 0 : index
    %65 = vector.load %arg7[%c0_41, %c0_42] : memref<8x1xf32, #tpu.memory_space<vmem>>, vector<8x1xf32>
    %66 = vector.broadcast %65 : vector<8x1xf32> to vector<8x256xf32>
    %67 = arith.addf %64, %66 : vector<8x256xf32>
    %68 = arith.addf %67, %1 : vector<8x256xf32>
    %cst_43 = arith.constant 0.000000e+00 : f32
    %69 = vector.broadcast %cst_43 : f32 to vector<8x256xf32>
    %70 = arith.maximumf %68, %69 : vector<8x256xf32>
    %c0_44 = arith.constant 0 : index
    %c0_45 = arith.constant 0 : index
    %c0_46 = arith.constant 0 : index
    %71 = vector.load %arg9[%c0_44, %c0_45, %c0_46] : memref<1x8x256xf32, #tpu.memory_space<vmem>>, vector<1x8x256xf32>
    %72 = vector.shape_cast %71 : vector<1x8x256xf32> to vector<8x256xf32>
    %73 = vector.shape_cast %70 : vector<8x256xf32> to vector<1x8x256xf32>
    tpu.vector_store %arg9[%c0_44, %c0_45, %c0_46], %73 {strides = array<i32>} : memref<1x8x256xf32, #tpu.memory_space<vmem>>, vector<1x8x256xf32>,
    return
  }
  func.func @transform_0(%arg0: i32) -> (i32, i32, i32) {
    %c0_i32 = arith.constant 0 : i32
    %c0_i32_0 = arith.constant 0 : i32
    %c0_i32_1 = arith.constant 0 : i32
    return %arg0, %c0_i32, %c0_i32_0 : i32, i32, i32
  }
  func.func @transform_1(%arg0: i32) -> (i32, i32, i32) {
    %c0_i32 = arith.constant 0 : i32
    %c0_i32_0 = arith.constant 0 : i32
    %c0_i32_1 = arith.constant 0 : i32
    %c0_i32_2 = arith.constant 0 : i32
    return %c0_i32, %c0_i32_0, %c0_i32_1 : i32, i32, i32
  }
  func.func @transform_2(%arg0: i32) -> (i32, i32, i32) {
    %c0_i32 = arith.constant 0 : i32
    %c0_i32_0 = arith.constant 0 : i32
    %c0_i32_1 = arith.constant 0 : i32
    %c0_i32_2 = arith.constant 0 : i32
    return %c0_i32, %c0_i32_0, %c0_i32_1 : i32, i32, i32
  }
  func.func @transform_3(%arg0: i32) -> (i32, i32) {
    %c0_i32 = arith.constant 0 : i32
    %c0_i32_0 = arith.constant 0 : i32
    %c0_i32_1 = arith.constant 0 : i32
    return %c0_i32, %c0_i32_0 : i32, i32
  }
  func.func @transform_4(%arg0: i32) -> (i32, i32) {
    %c0_i32 = arith.constant 0 : i32
    %c0_i32_0 = arith.constant 0 : i32
    %c0_i32_1 = arith.constant 0 : i32
    return %c0_i32, %c0_i32_0 : i32, i32
  }
  func.func @transform_5(%arg0: i32) -> (i32, i32) {
    %c0_i32 = arith.constant 0 : i32
    %c0_i32_0 = arith.constant 0 : i32
    %c0_i32_1 = arith.constant 0 : i32
    return %c0_i32, %c0_i32_0 : i32, i32
  }
  func.func @transform_6(%arg0: i32) -> (i32, i32) {
    %c0_i32 = arith.constant 0 : i32
    %c0_i32_0 = arith.constant 0 : i32
    %c0_i32_1 = arith.constant 0 : i32
    return %c0_i32, %c0_i32_0 : i32, i32
  }
  func.func @transform_7(%arg0: i32) -> (i32, i32) {
    %c0_i32 = arith.constant 0 : i32
    %c0_i32_0 = arith.constant 0 : i32
    %c0_i32_1 = arith.constant 0 : i32
    return %c0_i32, %c0_i32_0 : i32, i32
  }
  func.func @transform_8(%arg0: i32) -> (i32, i32, i32) {
    %c0_i32 = arith.constant 0 : i32
    %c0_i32_0 = arith.constant 0 : i32
    %c0_i32_1 = arith.constant 0 : i32
    return %arg0, %c0_i32, %c0_i32_0 : i32, i32, i32
  }
}

</mosaic_0001>

<bundles_post_ra>
// kernel: block_forward.1
= control target key start
LH: loop header
LB: loop body
LE: loop exit
PB: predicated region body
PF: predicated region fallthrough
CT: control target
= control target key end

     0   :  { %s1112_s27 = smov 0   ;;  %s1300_s0 = inlined_call_operand.vmem [shape: f32[2,8,256], index: 0, kind: input, shape index: {}]   ;;  %s1301_s1 = inlined_call_operand.vmem [shape: f32[3,8,24], index: 1, kind: input, shape index: {}]   ;;  %s1302_s2 = inlined_call_operand.vmem [shape: f32[3,8,24], index: 2, kind: input, shape index: {}]   ;;  %s1303_s3 = inlined_call_operand.vmem [shape: f32[8,1], index: 3, kind: input, shape index: {}]   ;;  %s1304_s4 = inlined_call_operand.vmem [shape: f32[8,1], index: 4, kind: input, shape index: {}]   ;;  %s1305_s5 = inlined_call_operand.vmem [shape: f32[8,1], index: 5, kind: input, shape index: {}]   ;;  %s1306_s6 = inlined_call_operand.vmem [shape: f32[8,1], index: 6, kind: input, shape index: {}]   ;;  %s1307_s7 = inlined_call_operand.vmem [shape: f32[4,256], index: 7, kind: input, shape index: {}]   ;;  %s1308_s8 = inlined_call_operand.vmem [shape: f32[2,8,256], index: 8, kind: output, shape index: {}]  }
   0x1 LB: > { %s987_s28 = sadd.s32 4294967295, %s1059_s27   ;;  %p991_p0 = scmp.ge.s32.totalorder %s1059_s27, 1  ;;  %s1059_s27 = sphi %s1112_s27, %s18_s27  }
   0x2   : > { %p262_p1 = scmp.lt.s32.totalorder %s1059_s27, 3 }
   0x4   : > { %p263_p2 = pnand %p991_p0, %p262_p1 }
   0x5   : > { %p296_p3 = scmp.lt.s32.totalorder (!%p263_p2), %s987_s28, 1  ;;  %s1061_s11 = smov (!%p263_p2), 16   ;;  %v1063_v2 = vmov (!%p263_p2), 0.0   ;;  %v629_v3 = vld [vmem:[%s1303_s3] sm:$0xff] (!%p263_p2)  ;;  %v1064_v4 = vmov (!%p263_p2), 0   ;;  %v319_v5 = vlaneseq (!%p263_p2)  ;;  %vm358_vm2 = vcmask (!%p263_p2), 195584  }
   0x6   : > { %266 = sbr.rel (%p263_p2) target bundleno = 978 (0x3d2), region = 52  ;;  %s1062_s12 = smov (!%p263_p2), 112   ;;  %426 = vmatprep.mubr.f32.mxu0 (!%p263_p2), %v1063_v2  ;;  %502 = vmatprep.mubr.f32.mxu1 (!%p263_p2), %v1063_v2  ;;  %v308_v10 = vld [vmem:[%s1307_s7] ss:$4 sm:$0x3] (!%p263_p2)  ;;  %v1000_v31 = vld [vmem:[%s1301_s1 + $0x8] sm:$0xff] (!%p263_p2) }
   0x7   : > { %1051 = vset.pattern.permute.xlu0 (!%p263_p2), %v1064_v4  ;;  %1052 = vset.pattern.permute.xlu1 (!%p263_p2), %v1064_v4  ;;  %v326_v6 = vshrl.u32 (!%p263_p2), %v319_v5, 7  ;;  %v1145_v7 = vand.u32 (!%p263_p2), 127, %v319_v5  ;;  %v996_v15 = vld [vmem:[%s1307_s7 + $0x1] ss:$4 sm:$0x3] (!%p263_p2)  ;;  %v1002_v32 = vld [vmem:[%s1301_s1 + $0x10] sm:$0xff] (!%p263_p2) }
   0x8   : > { %v357_v30 = vld [vmem:[%s1301_s1] sm:$0xff] (!%p263_p2)  ;;  %s1065_s25 = smov (!%p263_p2), 1   ;;  %s1066_s9 = smov (!%p263_p2), 127  }
   0x9   : > { %v1147_v8 = vsub.s32 (!%p263_p2), 0, %v326_v6  ;;  %v1149_v9 = vsub.s32 (!%p263_p2), 1, %v326_v6  ;;  %vm321_vm0 = vcmp.lt.s32.totalorder (!%p263_p2), %v1145_v7, 16  ;;  %vm341_vm1 = vcmp.lt.s32.totalorder (!%p263_p2), %v1145_v7, 112  ;;  %v637_v35 = vld [vmem:[%s1304_s4] sm:$0xff] (!%p263_p2) }
   0xa   : > { %v997_v42 = vld [vmem:[%s1307_s7 + $0x2] ss:$4 sm:$0x3] (!%p263_p2)  ;;  %vm589_vm3 = vcmp.lt.s32.totalorder (!%p263_p2), %v1145_v7, 1  ;;  %vm609_vm4 = vcmp.lt.s32.totalorder (!%p263_p2), %v1145_v7, 127 }
   0xb   : > { %v1156_v13 = vrot.slane (!%p263_p2), %v308_v10, %v1147_v8  ;;  %v1159_v14 = vrot.slane (!%p263_p2), %v308_v10, %v1149_v9  ;;  %v1172_v22 = vrot.slane (!%p263_p2), %v996_v15, %v1149_v9  ;;  %v1179_v26 = vrot.slane (!%p263_p2), %v996_v15, %v1147_v8  ;;  %v998_v48 = vld [vmem:[%s1307_s7 + $0x3] ss:$4 sm:$0x3] (!%p263_p2) }
   0xc   : > { %v1212_v44 = vrot.slane (!%p263_p2), %v997_v42, %v1147_v8  ;;  %v1215_v45 = vrot.slane (!%p263_p2), %v997_v42, %v1149_v9  ;;  %v1228_v52 = vrot.slane (!%p263_p2), %v998_v48, %v1147_v8  ;;  %v1231_v53 = vrot.slane (!%p263_p2), %v998_v48, %v1149_v9  ;;  %v910_v10 = vld [vmem:[%s1305_s5] sm:$0xff] (!%p263_p2) }
   0xd   : > { %s1310_s28 = smov (!%p296_p3, %s987_s28), 1 }
   0xe   : > { %s1011_s29 = sshll.u32 %s1310_s28, 4 }
   0xf   : > { %s300_s10 = scalar_lea.vmem %s1300_s0, %s1011_s29  ;;  %s305_s26 = scalar_lea.vmem %s1308_s8, %s1011_s29 }
  0x10   : > { %v1128_v0 = vld [vmem:[%s300_s10] sm:$0xff]  ;;  %v1134_v1 = vld [vmem:[%s300_s10 + $0x8] sm:$0xff] }
  0x11   : > { %315 = vrot.lane.b32.xlu0 %v1128_v0, %s1061_s11  ;;  %337 = vrot.lane.b32.xlu1 %v1128_v0, %s1062_s12 }
  0x15   : > { %317 = vrot.lane.b32.xlu0 %v1134_v1, %s1061_s11  ;;  %339 = vrot.lane.b32.xlu1 %v1134_v1, %s1062_s12 }
  0x19   : > { %632 = vperm.xlu0 %1051, %v629_v3  }
  0x83   : > { %v316_v11 = vpop.permute.xlu0 %315  ;;  %v338_v12 = vpop.permute.xlu1 %337 }
  0x87   : > { %v318_v16 = vpop.permute.xlu0 %317  ;;  %v340_v17 = vpop.permute.xlu1 %339 }
  0x88   : > { %v322_v18 = vsel %vm321_vm0, %v316_v11, %v318_v16  ;;  %v323_v19 = vsel %vm321_vm0, %v318_v16, %v316_v11  ;;  %v343_v23 = vsel %vm341_vm1, %v340_v17, %v338_v12  ;;  %v342_v27 = vsel %vm341_vm1, %v338_v12, %v340_v17 }
  0x89   : > { %v335_v20 = vmul.f32 %v1156_v13, %v323_v19  ;;  %v336_v21 = vmul.f32 %v1159_v14, %v322_v18  ;;  %v356_v28 = vmul.f32 %v1172_v22, %v343_v23  ;;  %v355_v29 = vmul.f32 %v1179_v26, %v342_v27 }
  0x8b   : > { %v1013_v24 = vpack.c.bf16 %v1134_v1, %v336_v21  ;;  %v1015_v25 = vpack.c.bf16 %v1128_v0, %v335_v20 }
  0x8d   : > { %1014 = vmatprep.subr.bf16.mxu0 %v1013_v24  ;;  %1018 = vmatprep.subr.bf16.mxu1 %v1013_v24 }
  0x8e   : > { %1016 = vmatpush1.bf16.msra.mxu0 %v1015_v25  ;;  %1020 = vmatpush1.bf16.msra.mxu1 %v1015_v25 }
  0x8f   : > { %366 = vmatprep.subr.mxu0 %v356_v28  ;;  %442 = vmatprep.subr.mxu1 %v356_v28 }
  0x92   : > { %367 = vmatpush1.msra.mxu0 %v355_v29  ;;  %443 = vmatpush1.msra.mxu1 %v355_v29 }
  0x93   : > { %999 = vmatmul.mubr.msk.f32.vlgmr.msra.gmra.mrb[0].mxu0 %vm358_vm2, %v357_v30  ;;  %1022 = vmatprep.subr.bf16.mxu0 %v1013_v24 }
  0x94   : > { %1024 = vmatpush1.bf16.msra.mxu0 %v1015_v25  ;;  %578 = vmatprep.mubr.f32.mxu0 %v1063_v2 }
  0x95   : > { %518 = vmatprep.subr.mxu0 %v356_v28  ;;  %1001 = vmatmul.mubr.msk.f32.vlgmr.msra.gmra.mrb[0].mxu1 %vm358_vm2, %v1000_v31  ;;  %v1005_v28 = vld [vmem:[%s1302_s2 + $0x8] sm:$0xff] }
  0x96   : > { %731 = vmatprep.mubr.f32.mxu1 %v1063_v2 }
  0x98   : > { %519 = vmatpush1.msra.mxu0 %v355_v29  ;;  %v633_v40 = vpop.permute.xlu0 %632 }
  0x99   : > { %1003 = vmatmul.mubr.msk.f32.vlgmr.msra.gmra.mrb[2].mxu0 %vm358_vm2, %v1002_v32 }
  0x9a   : > { %807 = vmatprep.mubr.f32.mxu0 %v1063_v2 }
 0x166   : > { %v428_v33 = vpop.f32.mrb[0].mxu0 }
 0x167   : > { %585 = vrot.lane.b32.xlu0 %v428_v33, %s1065_s25  ;;  %v430_v34 = vpop.f32.mrb[1].mxu0  ;;  %v918_v33 = vld [vmem:[%s1306_s6] sm:$0xff] }
 0x168   : > { %587 = vrot.lane.b32.xlu1 %v430_v34, %s1065_s25  ;;  %v504_v36 = vpop.f32.mrb[0].mxu1 }
 0x169   : > { %v506_v37 = vpop.f32.mrb[1].mxu1 }
 0x16b   : > { %640 = vperm.xlu0 %1051, %v637_v35  }
 0x16c   : > { %v580_v38 = vpop.f32.mrb[2].mxu0 }
 0x16d   : > { %605 = vrot.lane.b32.xlu1 %v580_v38, %s1066_s9  ;;  %v582_v39 = vpop.f32.mrb[3].mxu0 }
 0x171   : > { %607 = vrot.lane.b32.xlu1 %v582_v39, %s1066_s9 }
 0x1d9   : > { %v586_v43 = vpop.permute.xlu0 %585 }
 0x1da   : > { %v588_v41 = vpop.permute.xlu1 %587 }
 0x1db   : > { %v590_v46 = vsel %vm589_vm3, %v586_v43, %v588_v41  ;;  %v591_v47 = vsel %vm589_vm3, %v588_v41, %v586_v43 }
 0x1dc   : > { %v603_v50 = vmul.f32 %v1212_v44, %v591_v47  ;;  %v604_v51 = vmul.f32 %v1215_v45, %v590_v46 }
 0x1de   : > { %v625_v57 = vadd.f32 %v603_v50, %v504_v36  ;;  %v626_v58 = vadd.f32 %v604_v51, %v506_v37 }
 0x1df   : > { %v606_v49 = vpop.permute.xlu1 %605 }
 0x1e3   : > { %v608_v54 = vpop.permute.xlu1 %607 }
 0x1e4   : > { %v610_v55 = vsel %vm609_vm4, %v606_v49, %v608_v54  ;;  %v611_v56 = vsel %vm609_vm4, %v608_v54, %v606_v49 }
 0x1e5   : > { %v623_v59 = vmul.f32 %v1228_v52, %v610_v55  ;;  %v624_v60 = vmul.f32 %v1231_v53, %v611_v56 }
 0x1e7   : > { %v627_v61 = vadd.f32 %v625_v57, %v623_v59  ;;  %v628_v62 = vadd.f32 %v626_v58, %v624_v60 }
 0x1e9   : > { %v635_v63 = vmul.f32 %v633_v40, %v627_v61  ;;  %v636_v3 = vmul.f32 %v633_v40, %v628_v62 }
 0x1ea   : > { %v641_v4 = vpop.permute.xlu0 %640 }
 0x1eb   : > { %v643_v5 = vadd.f32 %v641_v4, %v635_v63  ;;  %v644_v6 = vadd.f32 %v641_v4, %v636_v3 }
 0x1ed   : > { %v645_v8 = vmax.f32 %v643_v5, 0.0  ;;  %v646_v9 = vmax.f32 %v644_v6, 0.0 }
 0x1ef   : > { %649 = vrot.lane.b32.xlu0 %v646_v9, %s1061_s11  ;;  %647 = vrot.lane.b32.xlu1 %v645_v8, %s1061_s11 }
 0x1f3   : > { %657 = vrot.lane.b32.xlu0 %v646_v9, %s1062_s12  ;;  %655 = vrot.lane.b32.xlu1 %v645_v8, %s1062_s12 }
 0x1f7   : > { %913 = vperm.xlu1 %1052, %v910_v10  }
 0x261   : > { %v650_v11 = vpop.permute.xlu0 %649  ;;  %v648_v12 = vpop.permute.xlu1 %647 }
 0x262   : > { %v651_v15 = vsel %vm321_vm0, %v648_v12, %v650_v11  ;;  %v652_v16 = vsel %vm321_vm0, %v650_v11, %v648_v12 }
 0x263   : > { %v653_v17 = vmul.f32 %v652_v16, %v1156_v13  ;;  %v654_v18 = vmul.f32 %v651_v15, %v1159_v14  ;;  %v663_v14 = vld [vmem:[%s1302_s2] sm:$0xff] }
 0x265   : > { %v1027_v19 = vpack.c.bf16 %v645_v8, %v653_v17  ;;  %v658_v20 = vpop.permute.xlu0 %657  ;;  %v656_v21 = vpop.permute.xlu1 %655  ;;  %v1025_v23 = vpack.c.bf16 %v646_v9, %v654_v18 }
 0x266   : > { %v660_v24 = vsel %vm341_vm1, %v658_v20, %v656_v21  ;;  %v659_v25 = vsel %vm341_vm1, %v656_v21, %v658_v20 }
 0x267   : > { %v662_v27 = vmul.f32 %v660_v24, %v1172_v22  ;;  %1026 = vmatprep.subr.bf16.mxu1 %v1025_v23  ;;  %1030 = vmatprep.subr.bf16.mxu0 %v1025_v23  ;;  %v661_v13 = vmul.f32 %v659_v25, %v1179_v26  ;;  %v1007_v22 = vld [vmem:[%s1302_s2 + $0x10] sm:$0xff] }
 0x268   : > { %1028 = vmatpush1.bf16.msra.mxu1 %v1027_v19  ;;  %1032 = vmatpush1.bf16.msra.mxu0 %v1027_v19 }
 0x269   : > { %671 = vmatprep.subr.mxu1 %v662_v27  ;;  %747 = vmatprep.subr.mxu0 %v662_v27 }
 0x26c   : > { %672 = vmatpush1.msra.mxu1 %v661_v13  ;;  %748 = vmatpush1.msra.mxu0 %v661_v13 }
 0x26d   : > { %1004 = vmatmul.mubr.msk.f32.vlgmr.msra.gmra.mrb[2].mxu1 %vm358_vm2, %v663_v14  ;;  %1034 = vmatprep.subr.bf16.mxu1 %v1025_v23 }
 0x26e   : > { %1036 = vmatpush1.bf16.msra.mxu1 %v1027_v19  ;;  %883 = vmatprep.mubr.f32.mxu1 %v1063_v2 }
 0x26f   : > { %823 = vmatprep.subr.mxu1 %v662_v27  ;;  %1006 = vmatmul.mubr.msk.f32.vlgmr.msra.gmra.mrb[4].mxu0 %vm358_vm2, %v1005_v28 }
 0x272   : > { %824 = vmatpush1.msra.mxu1 %v661_v13 }
 0x273   : > { %1008 = vmatmul.mubr.msk.f32.vlgmr.msra.gmra.mrb[4].mxu1 %vm358_vm2, %v1007_v22 }
 0x276   : > { %v914_v34 = vpop.permute.xlu1 %913 }
 0x340   : > { %v733_v26 = vpop.f32.mrb[2].mxu1 }
 0x341   : > { %v735_v29 = vpop.f32.mrb[3].mxu1  ;;  %890 = vrot.lane.b32.xlu1 %v733_v26, %s1065_s25 }
 0x342   : > { %892 = vrot.lane.b32.xlu0 %v735_v29, %s1065_s25  ;;  %v809_v30 = vpop.f32.mrb[4].mxu0 }
 0x343   : > { %v811_v31 = vpop.f32.mrb[5].mxu0 }
 0x346   : > { %v885_v32 = vpop.f32.mrb[4].mxu1 }
 0x347   : > { %898 = vrot.lane.b32.xlu0 %v885_v32, %s1066_s9  ;;  %v887_v2 = vpop.f32.mrb[5].mxu1 }
 0x348   : > { %900 = vrot.lane.b32.xlu1 %v887_v2, %s1066_s9 }
 0x34b   : > { %921 = vperm.xlu0 %1051, %v918_v33  }
 0x3b3   : > { %v891_v36 = vpop.permute.xlu1 %890 }
 0x3b4   : > { %v893_v35 = vpop.permute.xlu0 %892 }
 0x3b5   : > { %v894_v39 = vsel %vm589_vm3, %v891_v36, %v893_v35  ;;  %v895_v40 = vsel %vm589_vm3, %v893_v35, %v891_v36 }
 0x3b6   : > { %v896_v43 = vmul.f32 %v895_v40, %v1212_v44  ;;  %v897_v46 = vmul.f32 %v894_v39, %v1215_v45 }
 0x3b8   : > { %v906_v49 = vadd.f32 %v896_v43, %v809_v30  ;;  %v907_v50 = vadd.f32 %v897_v46, %v811_v31 }
 0x3b9   : > { %v899_v37 = vpop.permute.xlu0 %898 }
 0x3ba   : > { %v901_v38 = vpop.permute.xlu1 %900 }
 0x3bb   : > { %v902_v41 = vsel %vm609_vm4, %v899_v37, %v901_v38  ;;  %v903_v42 = vsel %vm609_vm4, %v901_v38, %v899_v37 }
 0x3bc   : > { %v904_v47 = vmul.f32 %v902_v41, %v1228_v52  ;;  %v905_v48 = vmul.f32 %v903_v42, %v1231_v53 }
 0x3be   : > { %v908_v51 = vadd.f32 %v906_v49, %v904_v47  ;;  %v909_v54 = vadd.f32 %v907_v50, %v905_v48 }
 0x3c0   : > { %v916_v55 = vmul.f32 %v914_v34, %v908_v51  ;;  %v917_v56 = vmul.f32 %v914_v34, %v909_v54 }
 0x3ca   : > { %v922_v57 = vpop.permute.xlu0 %921 }
 0x3cb   : > { %v924_v58 = vadd.f32 %v922_v57, %v916_v55  ;;  %v925_v59 = vadd.f32 %v922_v57, %v917_v56 }
 0x3cd   : > { %v926_v7 = vadd.f32 %v924_v58, %v1128_v0  ;;  %v927_v60 = vadd.f32 %v925_v59, %v1134_v1 }
 0x3cf   : > { %v928_v44 = vmax.f32 %v926_v7, 0.0  ;;  %v929_v45 = vmax.f32 %v927_v60, 0.0 }
 0x3d1   : > { %930 = vst [vmem:[%s305_s26] sm:$0xff] %v928_v44  ;;  %931 = vst [vmem:[%s305_s26 + $0x8] sm:$0xff] %v929_v45 }
 0x3d2 PF: > { %s18_s27 = sadd.s32 1, %s1059_s27  }
 0x3d3   : > { %p15_p4 = scmp.ge.s32.totalorder %s18_s27, 4  }
 0x3d5   :  { %17 = sbr.rel (!%p15_p4) target bundleno = 1 (0x1), region = 89 }

</bundles_post_ra>
